<compile_context>
chip_gen: v7x
topology: tpu7x:2x2x1
jax: 0.10.0
libtpu: 0.0.40
codegen_flags: <defaults>
</compile_context>

<pallas_src>
import functools

import jax
import jax.numpy as jnp
from jax import lax
from jax.experimental import pallas as pl
from jax.experimental.pallas import tpu as pltpu

_EPS = 1e-5  # PyTorch BatchNorm default eps


# ----------------------------------------------------------------------------
# Kernel 1: backbone (1x1 conv + ReLU stand-in) + global average pool
# ----------------------------------------------------------------------------
def _backbone_pool_kernel(img_ref, w_ref, b_ref, out_ref, acc_ref, *,
                          hw, inv_hw, padded):
    """One (core-split, batch-block, pixel-tile) grid step.

    img_ref : (NB, Cin, TP)   f32  image tile (pixels lane-dense, no cast)
    w_ref   : (Cin, Cout, 1)  f32  1x1 conv weight (VPU broadcast layout)
    b_ref   : (1, Cout, 1)    f32  conv bias
    out_ref : (1, NB, Cout, 1) f32 pooled partial sums, resident across tiles
    acc_ref : (NB, Cout, TP)  f32  lane-parallel running sum (VMEM scratch)
    """
    k = pl.program_id(2)
    nt = pl.num_programs(2)
    nb, cin, tp = img_ref.shape

    @pl.when(k == 0)
    def _():
        acc_ref[...] = jnp.zeros_like(acc_ref)

    # 1x1 conv as Cin broadcast multiply-adds on the VPU.  With Cin of 3-4 the
    # MXU (contraction depth 128/256) would be ~1.5-3% utilized; the VPU
    # finishes this in a few FMAs per vreg and keeps the MXU slots free.
    # TODO(synk): the real backbone is an arbitrary nn.Sequential; this 1x1
    # conv + ReLU is a synthetic stand-in.  For a wide-Cin (>= ~64) backbone
    # switch this to an MXU dot with bf16 operands.
    s = None
    for ci in range(cin):
        term = w_ref[ci] * img_ref[:, ci:ci + 1, :]        # (Cout,1)*(NB,1,TP)
        s = term if s is None else s + term
    feat = jnp.maximum(s + b_ref[...], 0.0)                # (NB, Cout, TP)

    if padded:
        # Mask pixels past H*W: ReLU(bias) on padded lanes would otherwise
        # pollute the pooled mean (zero-padding alone is not safe).
        pix0 = (pl.program_id(0) * nt + k) * tp
        lane = lax.broadcasted_iota(jnp.int32, (1, 1, tp), 2)
        feat = jnp.where(pix0 + lane < hw, feat, 0.0)

    # Lane-parallel accumulation: pure VPU adds every step.
    acc_ref[...] += feat

    @pl.when(k == nt - 1)
    def _():
        # Single cross-lane reduce + 1/HW scale, once per batch block.
        out_ref[0] = jnp.sum(acc_ref[...], axis=2, keepdims=True) * inv_hw


# ----------------------------------------------------------------------------
# Kernel 2: gender branch + FC head + softmax expectation (full batch)
# ----------------------------------------------------------------------------
def _bn_train(x, gamma, beta):
    """nn.BatchNorm1d in training mode: biased batch statistics over dim 0.

    NOTE: with batch size 1 this degenerates (var == 0 -> output == beta);
    PyTorch raises for N == 1 in training mode.  Running-stat buffers are not
    modeled (forward pass only).
    """
    mu = jnp.mean(x, axis=0, keepdims=True)
    var = jnp.mean((x - mu) ** 2, axis=0, keepdims=True)
    return gamma * (x - mu) * lax.rsqrt(var + _EPS) + beta


def _head_kernel(tex_ref, gender_ref,
                 gew_ref, geb_ref, gbng_ref, gbnb_ref,
                 fc0w_ref, fc0b_ref, bn0g_ref, bn0b_ref,
                 fc1w_ref, fc1b_ref, bn1g_ref, bn1b_ref,
                 outw_ref, outb_ref, dist_ref,
                 out_ref):
    bf16 = jnp.bfloat16
    c_out = tex_ref.shape[1]
    texture = tex_ref[...]                                  # (N, Cout) f32

    # gender branch: Linear(1, G) (in_features == 1 -> exact broadcast
    # multiply) + BN1d (batch stats) + ReLU, all f32.
    g = gender_ref[...] * gew_ref[...] + geb_ref[...]       # (N, G)
    g = jnp.maximum(_bn_train(g, gbng_ref[...], gbnb_ref[...]), 0.0)

    # cat([texture, gender_encode], dim=1) @ FC0 == split matmul (identical).
    # Matmul operands in bf16 (weights already stored bf16), f32 accumulation.
    x = (jnp.dot(texture.astype(bf16), fc0w_ref[:c_out, :],
                 preferred_element_type=jnp.float32)
         + jnp.dot(g.astype(bf16), fc0w_ref[c_out:, :],
                   preferred_element_type=jnp.float32)
         + fc0b_ref[...])
    x = jnp.maximum(_bn_train(x, bn0g_ref[...], bn0b_ref[...]), 0.0)   # (N,1024)

    x = jnp.dot(x.astype(bf16), fc1w_ref[...],
                preferred_element_type=jnp.float32) + fc1b_ref[...]
    x = jnp.maximum(_bn_train(x, bn1g_ref[...], bn1b_ref[...]), 0.0)   # (N,512)

    logits = jnp.dot(x.astype(bf16), outw_ref[...],
                     preferred_element_type=jnp.float32) + outb_ref[...]  # (N,240)

    # softmax(dim=1) then expectation over `distribute` (all f32).
    m = jnp.max(logits, axis=1, keepdims=True)
    e = jnp.exp(logits - m)
    p = e / jnp.sum(e, axis=1, keepdims=True)
    out_ref[...] = jnp.sum(p * dist_ref[...], axis=1, keepdims=True)   # (N,1)


# ----------------------------------------------------------------------------
# Wrapper
# ----------------------------------------------------------------------------
def _choose_tiles(n, cout, hw, *, tp_max, nb_max, feat_cap_bytes):
    """Pick (batch block NB, pixel tile TP).

    TP is a multiple of 128 (or full hw when hw < 128); NB is the largest
    divisor of n such that the per-step feature slab NB*Cout*TP*4 stays under
    `feat_cap_bytes` (keeps the VMEM scratch + Mosaic temporaries bounded,
    safe for v7x's 64 MiB VMEM, while making each grid step move lots of data).
    """
    if hw < 128:
        tp = hw
    else:
        tp = min(tp_max, (hw // 128) * 128)
        while cout * tp * 4 > feat_cap_bytes and tp > 128:
            tp = max(128, tp - 128)
    nb = 1
    for d in range(1, min(n, nb_max) + 1):
        if n % d == 0 and d * cout * tp * 4 <= feat_cap_bytes:
            nb = d
    return nb, tp


def myres_forward(image_nchw, gender, mean, div, params, *,
                  tp_max=16384, nb_max=32, feat_cap_bytes=4 * 1024 * 1024):
    n, cin, h, w = image_nchw.shape
    hw = h * w
    conv_w = params["conv_w"]                         # (Cin, Cout, 1) f32
    conv_b = params["conv_b"]                         # (1, Cout, 1)   f32
    cout = conv_w.shape[1]

    # NCHW is already pixel-minor: reshape only, keep f32 (no wrapper cast --
    # the dominant HBM stream is read exactly once by the kernel).
    img = image_nchw.reshape(n, cin, hw)

    nb, tp = _choose_tiles(n, cout, hw, tp_max=tp_max, nb_max=nb_max,
                           feat_cap_bytes=feat_cap_bytes)
    n_blocks = n // nb
    n_tiles_total = pl.cdiv(hw, tp)
    padded = n_tiles_total * tp > hw
    # Small-batch megacore (v7x): split the pixel tiles across two cores.
    cs = 2 if (n_blocks == 1 and n_tiles_total % 2 == 0) else 1
    nt = n_tiles_total // cs

    kernel = functools.partial(_backbone_pool_kernel,
                               hw=hw, inv_hw=float(1.0 / hw), padded=padded)

    partial_pooled = pl.pallas_call(
        kernel,
        out_shape=jax.ShapeDtypeStruct((cs, n, cout, 1), jnp.float32),
        grid_spec=pltpu.PrefetchScalarGridSpec(
            num_scalar_prefetch=0,
            grid=(cs, n_blocks, nt),
            in_specs=[
                # Image tile: NB samples x full Cin x TP lane-dense pixels.
                pl.BlockSpec((nb, cin, tp), lambda c, i, k: (i, 0, c * nt + k)),
                pl.BlockSpec((cin, cout, 1), lambda c, i, k: (0, 0, 0)),
                pl.BlockSpec((1, cout, 1), lambda c, i, k: (0, 0, 0)),
            ],
            out_specs=pl.BlockSpec((1, nb, cout, 1),
                                   lambda c, i, k: (c, i, 0, 0)),
            scratch_shapes=[pltpu.VMEM((nb, cout, tp), jnp.float32)],
        ),
        compiler_params=pltpu.CompilerParams(
            dimension_semantics=("parallel", "parallel", "arbitrary"),
            vmem_limit_bytes=40 * 1024 * 1024,   # <= 48 MiB keeps v7x (64 MiB) safe
        ),
        cost_estimate=pl.CostEstimate(
            flops=2 * n * hw * cout * (cin + 1),
            transcendentals=0,
            bytes_accessed=(n * cin * hw * 4 + cin * cout * 4 + cout * 4
                            + cs * n * cout * 4),
        ),
    )(img, conv_w, conv_b)

    # Combine the (at most 2) per-core partial sums; each already carries 1/HW.
    texture = jnp.sum(partial_pooled[..., 0], axis=0)          # (N, Cout) f32

    distribute = ((jnp.arange(0, 240, dtype=jnp.float32) - mean) / div
                  ).reshape(1, 240)

    head_inputs = (
        texture, gender.astype(jnp.float32),
        params["ge_w"], params["ge_b"], params["gbn_g"], params["gbn_b"],
        params["fc0_w"], params["fc0_b"], params["bn0_g"], params["bn0_b"],
        params["fc1_w"], params["fc1_b"], params["bn1_g"], params["bn1_b"],
        params["out_w"], params["out_b"], distribute,
    )
    vmem = pl.BlockSpec(memory_space=pltpu.MemorySpace.VMEM)
    out = pl.pallas_call(
        _head_kernel,
        out_shape=jax.ShapeDtypeStruct((n, 1), jnp.float32),
        in_specs=[vmem] * len(head_inputs),
        out_specs=vmem,
    )(*head_inputs)
    return out.reshape(n)


# ----------------------------------------------------------------------------
# Parameters + pure-JAX reference (validation only)
# ----------------------------------------------------------------------------
def init_params(key, cin, out_channels, gender_size):
    ks = jax.random.split(key, 5)

    def w(k, shape, scale=0.05):
        return (scale * jax.random.normal(k, shape)).astype(jnp.float32)

    f32, bf16 = jnp.float32, jnp.bfloat16
    return {
        # backbone stand-in: 1x1 conv, weight stored (Cin, Cout, 1) for the
        # kernel's VPU broadcast-FMA layout (f32: the conv runs on the VPU).
        "conv_w": w(ks[0], (cin, out_channels, 1)),
        "conv_b": jnp.zeros((1, out_channels, 1), f32),
        # gender_encoder: Linear(1, genderSize)
        "ge_w": w(ks[1], (1, gender_size)),
        "ge_b": jnp.zeros((1, gender_size), f32),
        "gbn_g": jnp.ones((1, gender_size), f32),
        "gbn_b": jnp.zeros((1, gender_size), f32),
        # Big head matmul weights live in bf16 end-to-end (halves their DMA);
        # biases / BN parameters / softmax stay f32.
        "fc0_w": w(ks[2], (out_channels + gender_size, 1024)).astype(bf16),
        "fc0_b": jnp.zeros((1, 1024), f32),
        "bn0_g": jnp.ones((1, 1024), f32),
        "bn0_b": jnp.zeros((1, 1024), f32),
        "fc1_w": w(ks[3], (1024, 512)).astype(bf16),
        "fc1_b": jnp.zeros((1, 512), f32),
        "bn1_g": jnp.ones((1, 512), f32),
        "bn1_b": jnp.zeros((1, 512), f32),
        "out_w": w(ks[4], (512, 240)).astype(bf16),
        "out_b": jnp.zeros((1, 240), f32),
    }


def reference_forward(image, gender, mean, div, params):
    """Pure-JAX reference mirroring the kernel math (used only to validate)."""
    bf16 = jnp.bfloat16
    n, cin, h, w = image.shape
    x = image.reshape(n, cin, h * w)
    w2 = params["conv_w"][:, :, 0]                                  # (Cin, Cout)
    feat = jnp.einsum("ncp,co->nop", x, w2, precision=lax.Precision.HIGHEST)
    feat = jnp.maximum(feat + params["conv_b"].reshape(1, -1, 1), 0.0)
    texture = jnp.mean(feat, axis=2)                                # (N, Cout)

    g = gender * params["ge_w"] + params["ge_b"]
    g = jnp.maximum(_bn_train(g, params["gbn_g"], params["gbn_b"]), 0.0)
    cat = jnp.concatenate([texture, g], axis=1)
    x = jnp.dot(cat.astype(bf16), params["fc0_w"],
                preferred_element_type=jnp.float32) + params["fc0_b"]
    x = jnp.maximum(_bn_train(x, params["bn0_g"], params["bn0_b"]), 0.0)
    x = jnp.dot(x.astype(bf16), params["fc1_w"],
                preferred_element_type=jnp.float32) + params["fc1_b"]
    x = jnp.maximum(_bn_train(x, params["bn1_g"], params["bn1_b"]), 0.0)
    logits = jnp.dot(x.astype(bf16), params["out_w"],
                     preferred_element_type=jnp.float32) + params["out_b"]
    p = jax.nn.softmax(logits, axis=1)
    distribute = ((jnp.arange(0, 240, dtype=jnp.float32) - mean) / div
                  ).reshape(1, 240)
    return jnp.sum(p * distribute, axis=1)


if __name__ == "__main__":
    key = jax.random.PRNGKey(0)
    k_img, k_gender, k_params, k_img2 = jax.random.split(key, 4)

    N, CIN, H, W = 2, 4, 16, 16
    OUT_CHANNELS, GENDER_SIZE = 32, 16
    MEAN, DIV = 120.0, 40.0

    image = jax.random.normal(k_img, (N, CIN, H, W), jnp.float32)      # NCHW
    gender = jax.random.bernoulli(k_gender, 0.5, (N, 1)).astype(jnp.float32)
    params = init_params(k_params, CIN, OUT_CHANNELS, GENDER_SIZE)

    ref = reference_forward(image, gender, MEAN, DIV, params)

    # Default tiling: one big lane-dense tile per batch block.
    out = myres_forward(image, gender, MEAN, DIV, params)
    out = jax.block_until_ready(out)
    assert out.shape == (N,)
    assert bool(jnp.all(jnp.isfinite(out)))
    assert jnp.allclose(out, ref, rtol=2e-3, atol=2e-3)

    # Forced multi-tile path: per-sample batch blocks + pixel-tile (k) accumulation.
    out_tiled = myres_forward(image, gender, MEAN, DIV, params,
                              tp_max=128, nb_max=1)
    out_tiled = jax.block_until_ready(out_tiled)
    assert jnp.allclose(out_tiled, out, rtol=1e-3, atol=1e-4)

    # Forced core-split path: pixel tiles split across the leading "parallel" axis.
    out_split = myres_forward(image, gender, MEAN, DIV, params,
                              tp_max=128, nb_max=2)
    out_split = jax.block_until_ready(out_split)
    assert jnp.allclose(out_split, out, rtol=1e-3, atol=1e-4)

    # Non-128-divisible H*W exercises the padded-lane mask.
    image_odd = jax.random.normal(k_img2, (N, CIN, 15, 15), jnp.float32)
    ref_odd = reference_forward(image_odd, gender, MEAN, DIV, params)
    out_odd = myres_forward(image_odd, gender, MEAN, DIV, params, tp_max=128)
    out_odd = jax.block_until_ready(out_odd)
    assert bool(jnp.all(jnp.isfinite(out_odd)))
    assert jnp.allclose(out_odd, ref_odd, rtol=2e-3, atol=2e-3)

    print("KERNEL_OK")
</pallas_src>

<mosaic_0001>
module attributes {stable_mosaic.version = 11 : i64} {
  func.func @_backbone_pool_kernel(%arg0: i32, %arg1: i32, %arg2: i32, %arg3: memref<2x4x256xf32, #tpu.memory_space<vmem>>, %arg4: memref<4x32x1xf32, #tpu.memory_space<vmem>>, %arg5: memref<1x32x1xf32, #tpu.memory_space<vmem>>, %arg6: memref<1x2x32x1xf32, #tpu.memory_space<vmem>>, %arg7: memref<2x32x256xf32, #tpu.memory_space<vmem>>) attributes {dimension_semantics = [#tpu.dimension_semantics<parallel>, #tpu.dimension_semantics<parallel>, #tpu.dimension_semantics<arbitrary>], iteration_bounds = array<i64: 1, 1, 1>, scalar_prefetch = 0 : i64, scratch_operands = 1 : i64, tpu.core_type = #tpu.core_type<tc>, window_params = [{transform_indices = @transform_0, window_bounds = array<i64: 2, 4, 256>}, {pipeline_mode = #tpu.pipeline_mode<synchronous>, transform_indices = @transform_1, window_bounds = array<i64: 4, 32, 1>}, {pipeline_mode = #tpu.pipeline_mode<synchronous>, transform_indices = @transform_2, window_bounds = array<i64: 1, 32, 1>}, {transform_indices = @transform_3, window_bounds = array<i64: 1, 2, 32, 1>}]} {
    %c0_i32 = arith.constant 0 : i32
    %0 = arith.cmpi eq, %arg2, %c0_i32 : i32
    %1 = arith.extui %0 : i1 to i32
    %c0_i32_0 = arith.constant 0 : i32
    %2 = arith.cmpi ne, %1, %c0_i32_0 : i32
    scf.if %2 {
      %cst_32 = arith.constant 0.000000e+00 : f32
      %45 = vector.broadcast %cst_32 : f32 to vector<2x32x256xf32>
      %c0_33 = arith.constant 0 : index
      %c0_34 = arith.constant 0 : index
      %c0_35 = arith.constant 0 : index
      %46 = vector.load %arg7[%c0_33, %c0_34, %c0_35] : memref<2x32x256xf32, #tpu.memory_space<vmem>>, vector<2x32x256xf32>
      tpu.vector_store %arg7[%c0_33, %c0_34, %c0_35], %45 {strides = array<i32>} : memref<2x32x256xf32, #tpu.memory_space<vmem>>, vector<2x32x256xf32>,
    } else {
    }
    %c0 = arith.constant 0 : index
    %c0_1 = arith.constant 0 : index
    %c0_2 = arith.constant 0 : index
    %3 = vector.load %arg4[%c0, %c0_1, %c0_2] : memref<4x32x1xf32, #tpu.memory_space<vmem>>, vector<1x32x1xf32>
    %4 = vector.shape_cast %3 : vector<1x32x1xf32> to vector<32x1xf32>
    %c0_3 = arith.constant 0 : index
    %c0_4 = arith.constant 0 : index
    %c0_5 = arith.constant 0 : index
    %5 = vector.load %arg3[%c0_3, %c0_4, %c0_5] : memref<2x4x256xf32, #tpu.memory_space<vmem>>, vector<2x1x256xf32>
    %6 = vector.shape_cast %4 : vector<32x1xf32> to vector<1x32x1xf32>
    %7 = vector.broadcast %6 : vector<1x32x1xf32> to vector<2x32x256xf32>
    %8 = vector.broadcast %5 : vector<2x1x256xf32> to vector<2x32x256xf32>
    %9 = arith.mulf %7, %8 : vector<2x32x256xf32>
    %c1 = arith.constant 1 : index
    %c0_6 = arith.constant 0 : index
    %c0_7 = arith.constant 0 : index
    %10 = vector.load %arg4[%c1, %c0_6, %c0_7] : memref<4x32x1xf32, #tpu.memory_space<vmem>>, vector<1x32x1xf32>
    %11 = vector.shape_cast %10 : vector<1x32x1xf32> to vector<32x1xf32>
    %c0_8 = arith.constant 0 : index
    %c1_9 = arith.constant 1 : index
    %c0_10 = arith.constant 0 : index
    %12 = vector.load %arg3[%c0_8, %c1_9, %c0_10] : memref<2x4x256xf32, #tpu.memory_space<vmem>>, vector<2x1x256xf32>
    %13 = vector.shape_cast %11 : vector<32x1xf32> to vector<1x32x1xf32>
    %14 = vector.broadcast %13 : vector<1x32x1xf32> to vector<2x32x256xf32>
    %15 = vector.broadcast %12 : vector<2x1x256xf32> to vector<2x32x256xf32>
    %16 = arith.mulf %14, %15 : vector<2x32x256xf32>
    %17 = arith.addf %9, %16 : vector<2x32x256xf32>
    %c2 = arith.constant 2 : index
    %c0_11 = arith.constant 0 : index
    %c0_12 = arith.constant 0 : index
    %18 = vector.load %arg4[%c2, %c0_11, %c0_12] : memref<4x32x1xf32, #tpu.memory_space<vmem>>, vector<1x32x1xf32>
    %19 = vector.shape_cast %18 : vector<1x32x1xf32> to vector<32x1xf32>
    %c0_13 = arith.constant 0 : index
    %c2_14 = arith.constant 2 : index
    %c0_15 = arith.constant 0 : index
    %20 = vector.load %arg3[%c0_13, %c2_14, %c0_15] : memref<2x4x256xf32, #tpu.memory_space<vmem>>, vector<2x1x256xf32>
    %21 = vector.shape_cast %19 : vector<32x1xf32> to vector<1x32x1xf32>
    %22 = vector.broadcast %21 : vector<1x32x1xf32> to vector<2x32x256xf32>
    %23 = vector.broadcast %20 : vector<2x1x256xf32> to vector<2x32x256xf32>
    %24 = arith.mulf %22, %23 : vector<2x32x256xf32>
    %25 = arith.addf %17, %24 : vector<2x32x256xf32>
    %c3 = arith.constant 3 : index
    %c0_16 = arith.constant 0 : index
    %c0_17 = arith.constant 0 : index
    %26 = vector.load %arg4[%c3, %c0_16, %c0_17] : memref<4x32x1xf32, #tpu.memory_space<vmem>>, vector<1x32x1xf32>
    %27 = vector.shape_cast %26 : vector<1x32x1xf32> to vector<32x1xf32>
    %c0_18 = arith.constant 0 : index
    %c3_19 = arith.constant 3 : index
    %c0_20 = arith.constant 0 : index
    %28 = vector.load %arg3[%c0_18, %c3_19, %c0_20] : memref<2x4x256xf32, #tpu.memory_space<vmem>>, vector<2x1x256xf32>
    %29 = vector.shape_cast %27 : vector<32x1xf32> to vector<1x32x1xf32>
    %30 = vector.broadcast %29 : vector<1x32x1xf32> to vector<2x32x256xf32>
    %31 = vector.broadcast %28 : vector<2x1x256xf32> to vector<2x32x256xf32>
    %32 = arith.mulf %30, %31 : vector<2x32x256xf32>
    %33 = arith.addf %25, %32 : vector<2x32x256xf32>
    %c0_21 = arith.constant 0 : index
    %c0_22 = arith.constant 0 : index
    %c0_23 = arith.constant 0 : index
    %34 = vector.load %arg5[%c0_21, %c0_22, %c0_23] : memref<1x32x1xf32, #tpu.memory_space<vmem>>, vector<1x32x1xf32>
    %35 = vector.broadcast %34 : vector<1x32x1xf32> to vector<2x32x256xf32>
    %36 = arith.addf %33, %35 : vector<2x32x256xf32>
    %cst = arith.constant 0.000000e+00 : f32
    %37 = vector.broadcast %cst : f32 to vector<2x32x256xf32>
    %38 = arith.maximumf %36, %37 : vector<2x32x256xf32>
    %c0_24 = arith.constant 0 : index
    %c0_25 = arith.constant 0 : index
    %c0_26 = arith.constant 0 : index
    %39 = vector.load %arg7[%c0_24, %c0_25, %c0_26] : memref<2x32x256xf32, #tpu.memory_space<vmem>>, vector<2x32x256xf32>
    %40 = arith.addf %39, %38 : vector<2x32x256xf32>
    %c0_27 = arith.constant 0 : index
    %c0_28 = arith.constant 0 : index
    %c0_29 = arith.constant 0 : index
    %41 = vector.load %arg7[%c0_27, %c0_28, %c0_29] : memref<2x32x256xf32, #tpu.memory_space<vmem>>, vector<2x32x256xf32>
    tpu.vector_store %arg7[%c0_27, %c0_28, %c0_29], %40 {strides = array<i32>} : memref<2x32x256xf32, #tpu.memory_space<vmem>>, vector<2x32x256xf32>,
    %c0_i32_30 = arith.constant 0 : i32
    %42 = arith.cmpi eq, %arg2, %c0_i32_30 : i32
    %43 = arith.extui %42 : i1 to i32
    %c0_i32_31 = arith.constant 0 : i32
    %44 = arith.cmpi ne, %43, %c0_i32_31 : i32
    scf.if %44 {
      %c0_32 = arith.constant 0 : index
      %c0_33 = arith.constant 0 : index
      %c0_34 = arith.constant 0 : index
      %45 = vector.load %arg7[%c0_32, %c0_33, %c0_34] : memref<2x32x256xf32, #tpu.memory_space<vmem>>, vector<2x32x256xf32>
      %cst_35 = arith.constant dense<0.000000e+00> : vector<2x32xf32>
      %46 = vector.multi_reduction <add>, %45, %cst_35 [2] : vector<2x32x256xf32> to vector<2x32xf32>
      %47 = vector.shape_cast %46 : vector<2x32xf32> to vector<2x32x1xf32>
      %cst_36 = arith.constant 3.906250e-03 : f32
      %48 = vector.broadcast %cst_36 : f32 to vector<2x32x1xf32>
      %49 = arith.mulf %47, %48 : vector<2x32x1xf32>
      %c0_37 = arith.constant 0 : index
      %c0_38 = arith.constant 0 : index
      %c0_39 = arith.constant 0 : index
      %c0_40 = arith.constant 0 : index
      %50 = vector.load %arg6[%c0_37, %c0_38, %c0_39, %c0_40] : memref<1x2x32x1xf32, #tpu.memory_space<vmem>>, vector<1x2x32x1xf32>
      %51 = vector.shape_cast %50 : vector<1x2x32x1xf32> to vector<2x32x1xf32>
      %52 = vector.shape_cast %49 : vector<2x32x1xf32> to vector<1x2x32x1xf32>
      tpu.vector_store %arg6[%c0_37, %c0_38, %c0_39, %c0_40], %52 {strides = array<i32>} : memref<1x2x32x1xf32, #tpu.memory_space<vmem>>, vector<1x2x32x1xf32>,
    } else {
    }
    return
  }
  func.func @transform_0(%arg0: i32, %arg1: i32, %arg2: i32) -> (i32, i32, i32) {
    %c1_i32 = arith.constant 1 : i32
    %0 = arith.muli %arg0, %c1_i32 : i32
    %1 = arith.addi %0, %arg2 : i32
    %c0_i32 = arith.constant 0 : i32
    %c0_i32_0 = arith.constant 0 : i32
    return %arg1, %c0_i32, %1 : i32, i32, i32
  }
  func.func @transform_1(%arg0: i32, %arg1: i32, %arg2: i32) -> (i32, i32, i32) {
    %c0_i32 = arith.constant 0 : i32
    %c0_i32_0 = arith.constant 0 : i32
    %c0_i32_1 = arith.constant 0 : i32
    %c0_i32_2 = arith.constant 0 : i32
    return %c0_i32, %c0_i32_0, %c0_i32_1 : i32, i32, i32
  }
  func.func @transform_2(%arg0: i32, %arg1: i32, %arg2: i32) -> (i32, i32, i32) {
    %c0_i32 = arith.constant 0 : i32
    %c0_i32_0 = arith.constant 0 : i32
    %c0_i32_1 = arith.constant 0 : i32
    %c0_i32_2 = arith.constant 0 : i32
    return %c0_i32, %c0_i32_0, %c0_i32_1 : i32, i32, i32
  }
  func.func @transform_3(%arg0: i32, %arg1: i32, %arg2: i32) -> (i32, i32, i32, i32) {
    %c0_i32 = arith.constant 0 : i32
    %c0_i32_0 = arith.constant 0 : i32
    %c0_i32_1 = arith.constant 0 : i32
    return %arg0, %arg1, %c0_i32, %c0_i32_0 : i32, i32, i32, i32
  }
}

</mosaic_0001>

<bundles_post_ra>
// kernel: tpu_custom_call.1
= control target key start
LH: loop header
LB: loop body
LE: loop exit
PB: predicated region body
PF: predicated region fallthrough
CT: control target
= control target key end

     0   :  { %v566_v0 = vmov 0   ;;  %v85_v21 = vlaneseq  ;;  %vm525_vm0 = vcmask 7168   ;;  %s757_s1 = inlined_call_operand.vmem [shape: f32[4,32,1], index: 1, kind: input, shape index: {}]   ;;  %s758_s2 = inlined_call_operand.vmem [shape: f32[1,32,1], index: 2, kind: input, shape index: {}]   ;;  %s759_s0 = inlined_call_operand.vmem [shape: f32[2,4,256], index: 0, kind: input, shape index: {}]   ;;  %s760_s3 = inlined_call_operand.vmem [shape: f32[1,2,32,1], index: 3, kind: output, shape index: {}]  }
   0x1   :  { %565 = vset.pattern.permute.xlu1 %v566_v0  ;;  %564 = vset.pattern.permute.xlu0 %v566_v0  ;;  %v58_v1 = vld [vmem:[%s757_s1 + $0x10] sm:$0xff]  ;;  %v56_v2 = vld [vmem:[%s757_s1] sm:$0xff]  ;;  %v59_v3 = vld [vmem:[%s757_s1 + $0x18] sm:$0xff] }
   0x2   :  { %75 = vperm.xlu1 %565, %v58_v1   ;;  %65 = vperm.xlu0 %564, %v56_v2   ;;  %v57_v4 = vld [vmem:[%s757_s1 + $0x8] sm:$0xff]  ;;  %v545_v6 = vld [vmem:[%s757_s1 + $0x20] sm:$0xff]  ;;  %v548_v7 = vld [vmem:[%s757_s1 + $0x38] sm:$0xff]  ;;  %v86_v22 = vshrl.u32 %v85_v21, 7 }
   0x3   :  { %v546_v5 = vld [vmem:[%s757_s1 + $0x28] sm:$0xff]  ;;  %v547_v8 = vld [vmem:[%s757_s1 + $0x30] sm:$0xff]  ;;  %v551_v10 = vld [vmem:[%s757_s1 + $0x40] sm:$0xff] }
   0x4   :  { %v552_v9 = vld [vmem:[%s757_s1 + $0x48] sm:$0xff]  ;;  %v554_v11 = vld [vmem:[%s757_s1 + $0x58] sm:$0xff]  ;;  %v553_v12 = vld [vmem:[%s757_s1 + $0x50] sm:$0xff]  ;;  %v87_v23 = vsub.s32 0, %v86_v22  ;;  %v91_v24 = vsub.s32 1, %v86_v22 }
   0x5   :  { %v558_v13 = vld [vmem:[%s757_s1 + $0x68] sm:$0xff]  ;;  %v557_v14 = vld [vmem:[%s757_s1 + $0x60] sm:$0xff]  ;;  %v560_v15 = vld [vmem:[%s757_s1 + $0x78] sm:$0xff] }
   0x6   :  { %80 = vperm.xlu1 %565, %v59_v3   ;;  %70 = vperm.xlu0 %564, %v57_v4   ;;  %v559_v16 = vld [vmem:[%s757_s1 + $0x70] sm:$0xff]  ;;  %v371_v17 = vld [vmem:[%s758_s2 + $0x8] sm:$0xff]  ;;  %v370_v18 = vld [vmem:[%s758_s2] sm:$0xff] }
   0x7   :  { %v373_v19 = vld [vmem:[%s758_s2 + $0x18] sm:$0xff]  ;;  %v372_v20 = vld [vmem:[%s758_s2 + $0x10] sm:$0xff]  ;;  %v60_v26 = vld [vmem:[%s759_s0] ss:$4 sm:$0x3] }
   0x8   :  { %v544_v27 = vld [vmem:[%s759_s0 + $0x8] ss:$4 sm:$0x3]  ;;  %v549_v29 = vld [vmem:[%s759_s0 + $0x1] ss:$4 sm:$0x3]  ;;  %v88_v33 = vrot.slane %v60_v26, %v87_v23  ;;  %v92_v34 = vrot.slane %v60_v26, %v91_v24 }
   0x9   :  { %v550_v30 = vld [vmem:[%s759_s0 + $0x9] ss:$4 sm:$0x3]  ;;  %v555_v31 = vld [vmem:[%s759_s0 + $0x2] ss:$4 sm:$0x3]  ;;  %v96_v35 = vrot.slane %v544_v27, %v87_v23  ;;  %v100_v36 = vrot.slane %v544_v27, %v91_v24  ;;  %v155_v41 = vrot.slane %v549_v29, %v87_v23  ;;  %v159_v42 = vrot.slane %v549_v29, %v91_v24 }
   0xa   :  { %137 = vperm.xlu1 %565, %v546_v5   ;;  %132 = vperm.xlu0 %564, %v545_v6   ;;  %v556_v32 = vld [vmem:[%s759_s0 + $0xa] ss:$4 sm:$0x3]  ;;  %v561_v37 = vld [vmem:[%s759_s0 + $0x3] ss:$4 sm:$0x3]  ;;  %v163_v43 = vrot.slane %v550_v30, %v87_v23  ;;  %v167_v44 = vrot.slane %v550_v30, %v91_v24  ;;  %v671_v45 = vrot.slane %v555_v31, %v87_v23 }
   0xb   :  { %v562_v38 = vld [vmem:[%s759_s0 + $0xb] ss:$4 sm:$0x3]  ;;  %v673_v46 = vrot.slane %v555_v31, %v91_v24  ;;  %v675_v47 = vrot.slane %v556_v32, %v87_v23  ;;  %v677_v48 = vrot.slane %v556_v32, %v91_v24  ;;  %v679_v49 = vrot.slane %v561_v37, %v87_v23 }
   0xc   :  { %v681_v50 = vrot.slane %v561_v37, %v91_v24  ;;  %v683_v51 = vrot.slane %v562_v38, %v87_v23  ;;  %v685_v52 = vrot.slane %v562_v38, %v91_v24 }
   0xe   :  { %147 = vperm.xlu1 %565, %v548_v7   ;;  %142 = vperm.xlu0 %564, %v547_v8  }
  0x12   :  { %220 = vperm.xlu1 %565, %v552_v9   ;;  %215 = vperm.xlu0 %564, %v551_v10  }
  0x16   :  { %230 = vperm.xlu1 %565, %v554_v11   ;;  %225 = vperm.xlu0 %564, %v553_v12  }
  0x1a   :  { %303 = vperm.xlu1 %565, %v558_v13   ;;  %298 = vperm.xlu0 %564, %v557_v14  }
  0x1e   :  { %313 = vperm.xlu1 %565, %v560_v15   ;;  %308 = vperm.xlu0 %564, %v559_v16  }
  0x22   :  { %381 = vperm.xlu1 %565, %v371_v17   ;;  %376 = vperm.xlu0 %564, %v370_v18  }
  0x26   :  { %391 = vperm.xlu1 %565, %v373_v19   ;;  %386 = vperm.xlu0 %564, %v372_v20  }
  0x81   :  { %v76_v25 = vpop.permute.xlu1 %75  ;;  %v66_v28 = vpop.permute.xlu0 %65 }
  0x82   :  { %v109_v53 = vmul.f32 %v88_v33, %v76_v25  ;;  %v110_v54 = vmul.f32 %v92_v34, %v76_v25  ;;  %v117_v55 = vmul.f32 %v96_v35, %v76_v25  ;;  %v118_v56 = vmul.f32 %v100_v36, %v76_v25 }
  0x83   :  { %v105_v57 = vmul.f32 %v88_v33, %v66_v28  ;;  %v106_v58 = vmul.f32 %v92_v34, %v66_v28  ;;  %v113_v59 = vmul.f32 %v96_v35, %v66_v28  ;;  %v114_v60 = vmul.f32 %v100_v36, %v66_v28 }
  0x85   :  { %v81_v39 = vpop.permute.xlu1 %80  ;;  %v71_v40 = vpop.permute.xlu0 %70 }
  0x86   :  { %v111_v63 = vmul.f32 %v88_v33, %v81_v39  ;;  %v112_v0 = vmul.f32 %v92_v34, %v81_v39  ;;  %v107_v3 = vmul.f32 %v88_v33, %v71_v40  ;;  %v108_v4 = vmul.f32 %v92_v34, %v71_v40 }
  0x87   :  { %v119_v11 = vmul.f32 %v96_v35, %v81_v39  ;;  %v120_v12 = vmul.f32 %v100_v36, %v81_v39  ;;  %v115_v13 = vmul.f32 %v96_v35, %v71_v40  ;;  %v116_v14 = vmul.f32 %v100_v36, %v71_v40 }
  0x89   :  { %v138_v61 = vpop.permute.xlu1 %137  ;;  %v133_v62 = vpop.permute.xlu0 %132 }
  0x8a   :  { %v174_v1 = vmul.f32 %v155_v41, %v138_v61  ;;  %v175_v2 = vmul.f32 %v159_v42, %v138_v61  ;;  %v182_v5 = vmul.f32 %v163_v43, %v138_v61  ;;  %v183_v6 = vmul.f32 %v167_v44, %v138_v61 }
  0x8b   :  { %v172_v7 = vmul.f32 %v155_v41, %v133_v62  ;;  %v173_v8 = vmul.f32 %v159_v42, %v133_v62  ;;  %v180_v9 = vmul.f32 %v163_v43, %v133_v62  ;;  %v181_v10 = vmul.f32 %v167_v44, %v133_v62 }
  0x8c   :  { %v190_v17 = vadd.f32 %v174_v1, %v107_v3  ;;  %v191_v18 = vadd.f32 %v175_v2, %v108_v4  ;;  %v198_v21 = vadd.f32 %v182_v5, %v115_v13  ;;  %v199_v22 = vadd.f32 %v183_v6, %v116_v14 }
  0x8d   :  { %v148_v15 = vpop.permute.xlu1 %147  ;;  %v143_v16 = vpop.permute.xlu0 %142  ;;  %v188_v25 = vadd.f32 %v172_v7, %v105_v57  ;;  %v189_v26 = vadd.f32 %v173_v8, %v106_v58  ;;  %v196_v27 = vadd.f32 %v180_v9, %v113_v59  ;;  %v197_v28 = vadd.f32 %v181_v10, %v114_v60 }
  0x8e   :  { %v178_v19 = vmul.f32 %v155_v41, %v148_v15  ;;  %v179_v20 = vmul.f32 %v159_v42, %v148_v15  ;;  %v186_v23 = vmul.f32 %v163_v43, %v148_v15  ;;  %v187_v24 = vmul.f32 %v167_v44, %v148_v15 }
  0x8f   :  { %v176_v29 = vmul.f32 %v155_v41, %v143_v16  ;;  %v177_v30 = vmul.f32 %v159_v42, %v143_v16  ;;  %v184_v31 = vmul.f32 %v163_v43, %v143_v16  ;;  %v185_v32 = vmul.f32 %v167_v44, %v143_v16 }
  0x90   :  { %v194_v35 = vadd.f32 %v178_v19, %v111_v63  ;;  %v195_v36 = vadd.f32 %v179_v20, %v112_v0  ;;  %v202_v39 = vadd.f32 %v186_v23, %v119_v11  ;;  %v203_v40 = vadd.f32 %v187_v24, %v120_v12 }
  0x91   :  { %v221_v33 = vpop.permute.xlu1 %220  ;;  %v216_v34 = vpop.permute.xlu0 %215  ;;  %v192_v44 = vadd.f32 %v176_v29, %v109_v53  ;;  %v193_v59 = vadd.f32 %v177_v30, %v110_v54  ;;  %v200_v60 = vadd.f32 %v184_v31, %v117_v55  ;;  %v201_v62 = vadd.f32 %v185_v32, %v118_v56 }
  0x92   :  { %v257_v37 = vmul.f32 %v671_v45, %v221_v33  ;;  %v258_v38 = vmul.f32 %v673_v46, %v221_v33  ;;  %v265_v61 = vmul.f32 %v675_v47, %v221_v33  ;;  %v266_v57 = vmul.f32 %v677_v48, %v221_v33 }
  0x93   :  { %v255_v58 = vmul.f32 %v671_v45, %v216_v34  ;;  %v256_v41 = vmul.f32 %v673_v46, %v216_v34  ;;  %v263_v42 = vmul.f32 %v675_v47, %v216_v34  ;;  %v264_v43 = vmul.f32 %v677_v48, %v216_v34 }
  0x94   :  { %v273_v1 = vadd.f32 %v257_v37, %v190_v17  ;;  %v274_v2 = vadd.f32 %v258_v38, %v191_v18  ;;  %v281_v5 = vadd.f32 %v265_v61, %v198_v21  ;;  %v282_v6 = vadd.f32 %v266_v57, %v199_v22 }
  0x95   :  { %v231_v63 = vpop.permute.xlu1 %230  ;;  %v226_v0 = vpop.permute.xlu0 %225  ;;  %v271_v9 = vadd.f32 %v255_v58, %v188_v25  ;;  %v272_v10 = vadd.f32 %v256_v41, %v189_v26  ;;  %v279_v53 = vadd.f32 %v263_v42, %v196_v27  ;;  %v280_v54 = vadd.f32 %v264_v43, %v197_v28 }
  0x96   :  { %v261_v3 = vmul.f32 %v671_v45, %v231_v63  ;;  %v262_v4 = vmul.f32 %v673_v46, %v231_v63  ;;  %v269_v7 = vmul.f32 %v675_v47, %v231_v63  ;;  %v270_v8 = vmul.f32 %v677_v48, %v231_v63 }
  0x97   :  { %v259_v55 = vmul.f32 %v671_v45, %v226_v0  ;;  %v260_v56 = vmul.f32 %v673_v46, %v226_v0  ;;  %v267_v11 = vmul.f32 %v675_v47, %v226_v0  ;;  %v268_v12 = vmul.f32 %v677_v48, %v226_v0 }
  0x98   :  { %v277_v15 = vadd.f32 %v261_v3, %v194_v35  ;;  %v278_v16 = vadd.f32 %v262_v4, %v195_v36  ;;  %v705_v19 = vadd.f32 %v269_v7, %v202_v39  ;;  %v707_v20 = vadd.f32 %v270_v8, %v203_v40 }
  0x99   :  { %v304_v13 = vpop.permute.xlu1 %303  ;;  %v299_v14 = vpop.permute.xlu0 %298  ;;  %v275_v23 = vadd.f32 %v259_v55, %v192_v44  ;;  %v276_v24 = vadd.f32 %v260_v56, %v193_v59  ;;  %v283_v25 = vadd.f32 %v267_v11, %v200_v60  ;;  %v284_v26 = vadd.f32 %v268_v12, %v201_v62 }
  0x9a   :  { %v340_v17 = vmul.f32 %v679_v49, %v304_v13  ;;  %v341_v18 = vmul.f32 %v681_v50, %v304_v13  ;;  %v348_v45 = vmul.f32 %v683_v51, %v304_v13  ;;  %v349_v46 = vmul.f32 %v685_v52, %v304_v13 }
  0x9b   :  { %v338_v47 = vmul.f32 %v679_v49, %v299_v14  ;;  %v339_v48 = vmul.f32 %v681_v50, %v299_v14  ;;  %v346_v21 = vmul.f32 %v683_v51, %v299_v14  ;;  %v347_v22 = vmul.f32 %v685_v52, %v299_v14 }
  0x9c   :  { %v356_v31 = vadd.f32 %v340_v17, %v273_v1  ;;  %v357_v32 = vadd.f32 %v341_v18, %v274_v2  ;;  %v364_v35 = vadd.f32 %v348_v45, %v281_v5  ;;  %v365_v36 = vadd.f32 %v349_v46, %v282_v6 }
  0x9d   :  { %v314_v27 = vpop.permute.xlu1 %313  ;;  %v309_v28 = vpop.permute.xlu0 %308  ;;  %v354_v37 = vadd.f32 %v338_v47, %v271_v9  ;;  %v355_v38 = vadd.f32 %v339_v48, %v272_v10  ;;  %v362_v39 = vadd.f32 %v346_v21, %v279_v53  ;;  %v363_v40 = vadd.f32 %v347_v22, %v280_v54 }
  0x9e   :  { %v344_v29 = vmul.f32 %v679_v49, %v314_v27  ;;  %v345_v30 = vmul.f32 %v681_v50, %v314_v27  ;;  %v342_v33 = vmul.f32 %v679_v49, %v309_v28  ;;  %v343_v34 = vmul.f32 %v681_v50, %v309_v28 }
  0x9f   :  { %v350_v61 = vmul.f32 %v683_v51, %v309_v28  ;;  %v351_v57 = vmul.f32 %v685_v52, %v309_v28  ;;  %v352_v11 = vmul.f32 %v683_v51, %v314_v27 }
  0xa0   :  { %v360_v42 = vadd.f32 %v344_v29, %v277_v15  ;;  %v361_v43 = vadd.f32 %v345_v30, %v278_v16  ;;  %v358_v63 = vadd.f32 %v342_v33, %v275_v23  ;;  %v359_v0 = vadd.f32 %v343_v34, %v276_v24 }
  0xa1   :  { %v382_v58 = vpop.permute.xlu1 %381  ;;  %v377_v41 = vpop.permute.xlu0 %376  ;;  %v366_v9 = vadd.f32 %v350_v61, %v283_v25  ;;  %v367_v10 = vadd.f32 %v351_v57, %v284_v26  ;;  %v353_v15 = vmul.f32 %v685_v52, %v314_v27  ;;  %v368_v51 = vadd.f32 %v352_v11, %v705_v19 }
  0xa2   :  { %v396_v44 = vadd.f32 %v382_v58, %v356_v31  ;;  %v397_v59 = vadd.f32 %v382_v58, %v357_v32  ;;  %v394_v60 = vadd.f32 %v377_v41, %v354_v37  ;;  %v395_v49 = vadd.f32 %v377_v41, %v355_v38 }
  0xa3   :  { %v402_v62 = vadd.f32 %v377_v41, %v362_v39  ;;  %v403_v50 = vadd.f32 %v377_v41, %v363_v40  ;;  %v404_v47 = vadd.f32 %v382_v58, %v364_v35  ;;  %v405_v48 = vadd.f32 %v382_v58, %v365_v36 }
  0xa4   :  { %v412_v1 = vmax.f32 %v396_v44, 0.0  ;;  %v413_v2 = vmax.f32 %v397_v59, 0.0  ;;  %v410_v3 = vmax.f32 %v394_v60, 0.0  ;;  %v411_v4 = vmax.f32 %v395_v49, 0.0 }
  0xa5   :  { %v392_v5 = vpop.permute.xlu1 %391  ;;  %v387_v6 = vpop.permute.xlu0 %386  ;;  %v418_v7 = vmax.f32 %v402_v62, 0.0  ;;  %v419_v8 = vmax.f32 %v403_v50, 0.0  ;;  %v369_v25 = vadd.f32 %v353_v15, %v707_v20  ;;  %v420_v52 = vmax.f32 %v404_v47, 0.0 }
  0xa6   :  { %v496_v53 = vadd.f32 %v413_v2, %v412_v1  ;;  %v493_v54 = vadd.f32 %v411_v4, %v410_v3  ;;  %v398_v55 = vadd.f32 %v387_v6, %v358_v63  ;;  %v399_v56 = vadd.f32 %v387_v6, %v359_v0 }
  0xa7   :  { %v406_v12 = vadd.f32 %v387_v6, %v366_v9  ;;  %v407_v13 = vadd.f32 %v387_v6, %v367_v10  ;;  %v400_v14 = vadd.f32 %v392_v5, %v360_v42  ;;  %v401_v18 = vadd.f32 %v392_v5, %v361_v43 }
  0xa8   :  { %497 = vadd.xlane.f32.xlu1 %v496_v53  ;;  %494 = vadd.xlane.f32.xlu0 %v493_v54  ;;  %v414_v16 = vmax.f32 %v398_v55, 0.0  ;;  %v415_v17 = vmax.f32 %v399_v56, 0.0  ;;  %v505_v45 = vadd.f32 %v419_v8, %v418_v7  ;;  %v421_v26 = vmax.f32 %v405_v48, 0.0 }
  0xa9   :  { %v422_v46 = vmax.f32 %v406_v12, 0.0  ;;  %v423_v22 = vmax.f32 %v407_v13, 0.0  ;;  %v416_v23 = vmax.f32 %v400_v14, 0.0  ;;  %v417_v24 = vmax.f32 %v401_v18, 0.0 }
  0xaa   :  { %v499_v21 = vadd.f32 %v415_v17, %v414_v16  ;;  %v408_v29 = vadd.f32 %v392_v5, %v368_v51  ;;  %v409_v30 = vadd.f32 %v392_v5, %v369_v25  ;;  %v508_v31 = vadd.f32 %v421_v26, %v420_v52 }
  0xab   :  { %v511_v27 = vadd.f32 %v423_v22, %v422_v46  ;;  %v502_v28 = vadd.f32 %v417_v24, %v416_v23 }
  0xac   :  { %506 = vadd.xlane.f32.xlu1 %v505_v45  ;;  %500 = vadd.xlane.f32.xlu0 %v499_v21  ;;  %v424_v32 = vmax.f32 %v408_v29, 0.0  ;;  %v425_v33 = vmax.f32 %v409_v30, 0.0 }
  0xae   :  { %v514_v34 = vadd.f32 %v425_v33, %v424_v32 }
  0xb0   :  { %512 = vadd.xlane.f32.xlu1 %v511_v27  ;;  %503 = vadd.xlane.f32.xlu0 %v502_v28 }
  0xb4   :  { %509 = vadd.xlane.f32.xlu0 %v508_v31 }
  0xb8   :  { %515 = vadd.xlane.f32.xlu0 %v514_v34 }
 0x135   :  { %v498_v35 = vpop.xlane.xlu1 %497  ;;  %v495_v36 = vpop.xlane.xlu0 %494 }
 0x136   :  { %v518_v19 = vmul.f32 0.00390625, %v498_v35  ;;  %v517_v37 = vmul.f32 0.00390625, %v495_v36 }
 0x138   :  { %527 = vst.msk [vmem:[%s760_s3 + $0x8] sm:$0xff] %vm525_vm0, %v518_v19  ;;  %526 = vst.msk [vmem:[%s760_s3] sm:$0xff] %vm525_vm0, %v517_v37 }
 0x139   :  { %v507_v20 = vpop.xlane.xlu1 %506  ;;  %v501_v38 = vpop.xlane.xlu0 %500 }
 0x13a   :  { %v521_v39 = vmul.f32 0.00390625, %v507_v20  ;;  %v519_v40 = vmul.f32 0.00390625, %v501_v38 }
 0x13c   :  { %530 = vst.msk [vmem:[%s760_s3 + $0x20] sm:$0xff] %vm525_vm0, %v521_v39  ;;  %528 = vst.msk [vmem:[%s760_s3 + $0x10] sm:$0xff] %vm525_vm0, %v519_v40 }
 0x13d   :  { %v513_v61 = vpop.xlane.xlu1 %512  ;;  %v504_v57 = vpop.xlane.xlu0 %503 }
 0x13e   :  { %v523_v58 = vmul.f32 0.00390625, %v513_v61  ;;  %v520_v41 = vmul.f32 0.00390625, %v504_v57 }
 0x140   :  { %532 = vst.msk [vmem:[%s760_s3 + $0x30] sm:$0xff] %vm525_vm0, %v523_v58  ;;  %529 = vst.msk [vmem:[%s760_s3 + $0x18] sm:$0xff] %vm525_vm0, %v520_v41 }
 0x141   :  { %v510_v42 = vpop.xlane.xlu0 %509 }
 0x142   :  { %v522_v43 = vmul.f32 0.00390625, %v510_v42 }
 0x144   :  { %531 = vst.msk [vmem:[%s760_s3 + $0x28] sm:$0xff] %vm525_vm0, %v522_v43 }
 0x145   :  { %v516_v44 = vpop.xlane.xlu0 %515 }
 0x146   :  { %v524_v59 = vmul.f32 0.00390625, %v516_v44 }
 0x148   :  { %533 = vst.msk [vmem:[%s760_s3 + $0x38] sm:$0xff] %vm525_vm0, %v524_v59 }

</bundles_post_ra>
